<compile_context>
chip_gen: v7x
topology: tpu7x:2x2x1
jax: 0.10.0
libtpu: 0.0.40
codegen_flags: <defaults>
</compile_context>

<pallas_src>
import jax
import jax.numpy as jnp
from jax.experimental import pallas as pl
from jax.experimental.pallas import tpu as pltpu


def _mlp_chooser_kernel(x_ref, w1_ref, b1_ref, w2_ref, b2_ref, w3_ref, b3_ref, o_ref):
    # Layer 1: Linear(F, 256) + ReLU  — bf16 MXU matmul, f32 accumulation.
    x = x_ref[...]
    if x.dtype != jnp.bfloat16:
        x = x.astype(jnp.bfloat16)
    h1 = jnp.dot(x, w1_ref[...], preferred_element_type=jnp.float32) + b1_ref[...]
    h1 = jnp.maximum(h1, 0.0)

    # Layer 2: Linear(256, 128) + ReLU — bf16 MXU matmul, f32 accumulation.
    h2 = (
        jnp.dot(h1.astype(jnp.bfloat16), w2_ref[...], preferred_element_type=jnp.float32)
        + b2_ref[...]
    )
    h2 = jnp.maximum(h2, 0.0)

    # Layer 3: Linear(128, 1), computed lane-dense.  w3_ref is (8, 128) with the
    # real weights in row 0 (rows 1-7 zero), so (8,128) @ (128, tile_b) keeps
    # fully tile-aligned operands; row 0 of the result is the logit row.
    scores = jnp.dot(w3_ref[...], h2.T, preferred_element_type=jnp.float32)  # (8, tile_b)
    logits = scores[0:1, :] + b3_ref[0]                                      # (1, tile_b)

    # nn.Softmax() over the size-1 output axis == exp(x - x): 1.0 for finite
    # logits, NaN propagated otherwise — bit-equivalent to the full softmax.
    o_ref[...] = jnp.exp(logits - logits).astype(o_ref.dtype)


def _round_up(n, m):
    return ((n + m - 1) // m) * m


def _query_tpu():
    """Best-effort (vmem_capacity_bytes, tensorcores_per_chip) with safe fallbacks."""
    vmem_cap = 64 * 1024 * 1024  # conservative default: v7x per-core VMEM
    num_cores = 1
    try:
        info = pltpu.get_tpu_info()
    except Exception:
        return vmem_cap, num_cores
    cap = getattr(info, "vmem_capacity_bytes", None)
    if isinstance(cap, int) and cap > 0:
        vmem_cap = cap
    for name in ("num_cores", "num_tensorcores", "tensorcore_count", "core_count"):
        v = getattr(info, name, None)
        if isinstance(v, int) and v > 1:
            num_cores = v
            break
    return vmem_cap, num_cores


def mlp_chooser_forward(features, w1, b1, w2, b2, w3, b3, *, tile_b=2048):
    """features: (B, F) f32 or bf16.  w*: (in, out), b*: (out,).  Returns (B, 1) f32."""
    B, F = features.shape
    x_bytes = jnp.dtype(features.dtype).itemsize

    vmem_cap, num_cores = _query_tpu()

    # ---- VMEM-aware batch tile --------------------------------------------
    # Per-row bytes: double-buffered x, f32 h1/h2 + bf16 copy of h1, h2.T and
    # the (8, tile) layer-3 result, double-buffered lane-dense output row.
    per_row = 2 * F * x_bytes + 256 * (4 + 2) + 128 * (4 + 4) + 8 * 4 + 2 * 4
    weight_bytes = (F * 256 + 256 * 128) * 2 + (8 * 128 + 256 + 128) * 4 + 8
    budget = max(vmem_cap // 2 - 2 * weight_bytes, 1 * 1024 * 1024)
    tile_cap = max(128, min(budget // per_row, 1 << 16) // 128 * 128)
    target = max(128, min(int(tile_b), tile_cap))

    B8 = _round_up(B, 8)
    if B8 <= 2 * 128:
        # Too small to split into >=2 lane-aligned tiles; one tile, pad to x8.
        tile = B8
        n_tiles = 1
    else:
        # >=2 grid steps so the x stream pipelines; >=2 tiles per TensorCore
        # when the chip has more than one.  Tile rounded to 128 rows so the
        # lane-dense output block satisfies the (., 128) tiling constraint,
        # keeping padding well below one tile.
        min_tiles = 2 * num_cores if num_cores > 1 else 2
        n_tiles = max(min_tiles, pl.cdiv(B8, target))
        tile = _round_up(pl.cdiv(B8, n_tiles), 128)
        n_tiles = pl.cdiv(B8, tile)
    B_pad = n_tiles * tile

    if B_pad != B:
        features = jnp.pad(features, ((0, B_pad - B), (0, 0)))

    # ---- Weight layout / dtype prep (once, in the wrapper) -----------------
    w1_bf = w1.astype(jnp.bfloat16)                    # (F, 256) bf16 at rest
    w2_bf = w2.astype(jnp.bfloat16)                    # (256, 128) bf16 at rest
    b1_2d = b1.reshape(1, -1).astype(jnp.float32)      # (1, 256)
    b2_2d = b2.reshape(1, -1).astype(jnp.float32)      # (1, 128)
    w3_pad = jnp.zeros((8, 128), jnp.float32).at[0, :].set(
        w3.reshape(-1).astype(jnp.float32))            # (8, 128), row 0 = w3
    b3_1d = b3.reshape(-1).astype(jnp.float32)         # (1,) — lives in SMEM

    # vmem_limit: actual requirement with 2x headroom (not a blanket 48 MiB).
    req = 2 * weight_bytes + tile * per_row
    vmem_limit = int(min(vmem_cap * 3 // 4, max(2 * req, 16 * 1024 * 1024)))

    if num_cores > 1 and n_tiles >= 2 * num_cores and n_tiles % num_cores == 0:
        dims = (pltpu.CORE_PARALLEL,)    # really shard batch tiles over cores
    else:
        dims = ("parallel",)             # safe no-op on single-core chips

    def resident(arr):
        return pl.BlockSpec(arr.shape, lambda *_: (0,) * arr.ndim)

    out = pl.pallas_call(
        _mlp_chooser_kernel,
        out_shape=jax.ShapeDtypeStruct((1, B_pad), jnp.float32),
        grid=(n_tiles,),
        in_specs=[
            pl.BlockSpec((tile, F), lambda i: (i, 0)),          # x: tiled over batch
            resident(w1_bf),                                    # weights/biases:
            resident(b1_2d),                                    # DMA once, stay
            resident(w2_bf),                                    # VMEM-resident
            resident(b2_2d),
            resident(w3_pad),
            pl.BlockSpec(memory_space=pltpu.MemorySpace.SMEM),  # b3 scalar
        ],
        # Lane-dense output slab: one (1, tile) row per grid step.
        out_specs=pl.BlockSpec((1, tile), lambda i: (0, i)),
        compiler_params=pltpu.CompilerParams(
            dimension_semantics=dims,
            vmem_limit_bytes=vmem_limit,
        ),
    )(features, w1_bf, b1_2d, w2_bf, b2_2d, w3_pad, b3_1d)

    return out.reshape(-1)[:B].reshape(B, 1)


def _init_linear(key, fan_in, fan_out):
    """PyTorch-style init U(-1/sqrt(fan_in), 1/sqrt(fan_in)); W stored as (in, out)."""
    kw, kb = jax.random.split(key)
    bound = 1.0 / jnp.sqrt(jnp.float32(fan_in))
    w = jax.random.uniform(kw, (fan_in, fan_out), jnp.float32, -bound, bound)
    b = jax.random.uniform(kb, (fan_out,), jnp.float32, -bound, bound)
    return w, b


if __name__ == "__main__":
    key = jax.random.PRNGKey(0)
    k_x, k1, k2, k3 = jax.random.split(key, 4)

    batch = 8
    feature_dim = 32

    features = jax.random.normal(k_x, (batch, feature_dim), jnp.float32)

    w1, b1 = _init_linear(k1, feature_dim, 256)
    w2, b2 = _init_linear(k2, 256, 128)
    w3, b3 = _init_linear(k3, 128, 1)

    out = mlp_chooser_forward(features, w1, b1, w2, b2, w3, b3)
    out = jax.block_until_ready(out)

    # Reference in plain JAX (f32 math).  Softmax over the size-1 axis is 1.0,
    # so the bf16 matmul path cannot perturb the final output.
    h1 = jnp.maximum(features @ w1 + b1, 0.0)
    h2 = jnp.maximum(h1 @ w2 + b2, 0.0)
    logits = h2 @ w3 + b3
    ref = jax.nn.softmax(logits, axis=-1)  # (B, 1) of ones

    assert out.shape == (batch, 1), out.shape
    assert jnp.allclose(out, ref, atol=1e-5), (out, ref)

    print("KERNEL_OK")
</pallas_src>

<mosaic_0001>
module attributes {stable_mosaic.version = 11 : i64} {
  func.func @_mlp_chooser_kernel(%arg0: i32, %arg1: memref<8x32xf32, #tpu.memory_space<vmem>>, %arg2: memref<32x256xbf16, #tpu.memory_space<vmem>>, %arg3: memref<1x256xf32, #tpu.memory_space<vmem>>, %arg4: memref<256x128xbf16, #tpu.memory_space<vmem>>, %arg5: memref<1x128xf32, #tpu.memory_space<vmem>>, %arg6: memref<8x128xf32, #tpu.memory_space<vmem>>, %arg7: memref<1xf32, #tpu.memory_space<smem>>, %arg8: memref<1x8xf32, #tpu.memory_space<vmem>>) attributes {dimension_semantics = [#tpu.dimension_semantics<parallel>], iteration_bounds = array<i64: 1>, scalar_prefetch = 0 : i64, scratch_operands = 0 : i64, tpu.core_type = #tpu.core_type<tc>, window_params = [{transform_indices = @transform_0, window_bounds = array<i64: 8, 32>}, {pipeline_mode = #tpu.pipeline_mode<synchronous>, transform_indices = @transform_1, window_bounds = array<i64: 32, 256>}, {pipeline_mode = #tpu.pipeline_mode<synchronous>, transform_indices = @transform_2, window_bounds = array<i64: 1, 256>}, {pipeline_mode = #tpu.pipeline_mode<synchronous>, transform_indices = @transform_3, window_bounds = array<i64: 256, 128>}, {pipeline_mode = #tpu.pipeline_mode<synchronous>, transform_indices = @transform_4, window_bounds = array<i64: 1, 128>}, {pipeline_mode = #tpu.pipeline_mode<synchronous>, transform_indices = @transform_5, window_bounds = array<i64: 8, 128>}, {transform_indices = @transform_6, window_bounds = array<i64: 1>}, {transform_indices = @transform_7, window_bounds = array<i64: 1, 8>}]} {
    %c0 = arith.constant 0 : index
    %c0_0 = arith.constant 0 : index
    %0 = vector.load %arg1[%c0, %c0_0] : memref<8x32xf32, #tpu.memory_space<vmem>>, vector<8x32xf32>
    %1 = arith.truncf %0 : vector<8x32xf32> to vector<8x32xbf16>
    %c0_1 = arith.constant 0 : index
    %c0_2 = arith.constant 0 : index
    %2 = vector.load %arg2[%c0_1, %c0_2] : memref<32x256xbf16, #tpu.memory_space<vmem>>, vector<32x256xbf16>
    %cst = arith.constant dense<0.000000e+00> : vector<8x256xf32>
    %3 = tpu.matmul %1, %2, %cst {dimension_numbers = #tpu.dot_dimension_numbers<[1], [0], [0], [1], [0, 0, 1, 1], [], []>} : vector<8x32xbf16>, vector<32x256xbf16>, vector<8x256xf32> -> vector<8x256xf32>
    %c0_3 = arith.constant 0 : index
    %c0_4 = arith.constant 0 : index
    %4 = vector.load %arg3[%c0_3, %c0_4] : memref<1x256xf32, #tpu.memory_space<vmem>>, vector<1x256xf32>
    %5 = vector.broadcast %4 : vector<1x256xf32> to vector<8x256xf32>
    %6 = arith.addf %3, %5 : vector<8x256xf32>
    %cst_5 = arith.constant 0.000000e+00 : f32
    %7 = vector.broadcast %cst_5 : f32 to vector<8x256xf32>
    %8 = arith.maximumf %6, %7 : vector<8x256xf32>
    %9 = arith.truncf %8 : vector<8x256xf32> to vector<8x256xbf16>
    %c0_6 = arith.constant 0 : index
    %c0_7 = arith.constant 0 : index
    %10 = vector.load %arg4[%c0_6, %c0_7] : memref<256x128xbf16, #tpu.memory_space<vmem>>, vector<256x128xbf16>
    %cst_8 = arith.constant dense<0.000000e+00> : vector<8x128xf32>
    %11 = tpu.matmul %9, %10, %cst_8 {dimension_numbers = #tpu.dot_dimension_numbers<[1], [0], [0], [1], [0, 0, 1, 1], [], []>} : vector<8x256xbf16>, vector<256x128xbf16>, vector<8x128xf32> -> vector<8x128xf32>
    %c0_9 = arith.constant 0 : index
    %c0_10 = arith.constant 0 : index
    %12 = vector.load %arg5[%c0_9, %c0_10] : memref<1x128xf32, #tpu.memory_space<vmem>>, vector<1x128xf32>
    %13 = vector.broadcast %12 : vector<1x128xf32> to vector<8x128xf32>
    %14 = arith.addf %11, %13 : vector<8x128xf32>
    %cst_11 = arith.constant 0.000000e+00 : f32
    %15 = vector.broadcast %cst_11 : f32 to vector<8x128xf32>
    %16 = arith.maximumf %14, %15 : vector<8x128xf32>
    %c0_12 = arith.constant 0 : index
    %c0_13 = arith.constant 0 : index
    %17 = vector.load %arg6[%c0_12, %c0_13] : memref<8x128xf32, #tpu.memory_space<vmem>>, vector<8x128xf32>
    %18 = tpu.transpose %16, [1, 0] : vector<8x128xf32> -> vector<128x8xf32>
    %cst_14 = arith.constant dense<0.000000e+00> : vector<8x8xf32>
    %19 = tpu.matmul %17, %18, %cst_14 {dimension_numbers = #tpu.dot_dimension_numbers<[1], [0], [0], [1], [0, 0, 1, 1], [], []>} : vector<8x128xf32>, vector<128x8xf32>, vector<8x8xf32> -> vector<8x8xf32>
    %20 = vector.extract_strided_slice %19 {offsets = [0, 0], sizes = [1, 8], strides = [1, 1]} : vector<8x8xf32> to vector<1x8xf32>
    %c0_15 = arith.constant 0 : index
    %21 = memref.load %arg7[%c0_15] : memref<1xf32, #tpu.memory_space<smem>>
    %22 = vector.broadcast %21 : f32 to vector<1x8xf32>
    %23 = arith.addf %20, %22 : vector<1x8xf32>
    %24 = arith.subf %23, %23 : vector<1x8xf32>
    %25 = math.exp %24 : vector<1x8xf32>
    %c0_16 = arith.constant 0 : index
    %c0_17 = arith.constant 0 : index
    %26 = vector.load %arg8[%c0_16, %c0_17] : memref<1x8xf32, #tpu.memory_space<vmem>>, vector<1x8xf32>
    tpu.vector_store %arg8[%c0_16, %c0_17], %25 {strides = array<i32>} : memref<1x8xf32, #tpu.memory_space<vmem>>, vector<1x8xf32>,
    return
  }
  func.func @transform_0(%arg0: i32) -> (i32, i32) {
    %c0_i32 = arith.constant 0 : i32
    %c0_i32_0 = arith.constant 0 : i32
    return %arg0, %c0_i32 : i32, i32
  }
  func.func @transform_1(%arg0: i32) -> (i32, i32) {
    %c0_i32 = arith.constant 0 : i32
    %c0_i32_0 = arith.constant 0 : i32
    %c0_i32_1 = arith.constant 0 : i32
    return %c0_i32, %c0_i32_0 : i32, i32
  }
  func.func @transform_2(%arg0: i32) -> (i32, i32) {
    %c0_i32 = arith.constant 0 : i32
    %c0_i32_0 = arith.constant 0 : i32
    %c0_i32_1 = arith.constant 0 : i32
    return %c0_i32, %c0_i32_0 : i32, i32
  }
  func.func @transform_3(%arg0: i32) -> (i32, i32) {
    %c0_i32 = arith.constant 0 : i32
    %c0_i32_0 = arith.constant 0 : i32
    %c0_i32_1 = arith.constant 0 : i32
    return %c0_i32, %c0_i32_0 : i32, i32
  }
  func.func @transform_4(%arg0: i32) -> (i32, i32) {
    %c0_i32 = arith.constant 0 : i32
    %c0_i32_0 = arith.constant 0 : i32
    %c0_i32_1 = arith.constant 0 : i32
    return %c0_i32, %c0_i32_0 : i32, i32
  }
  func.func @transform_5(%arg0: i32) -> (i32, i32) {
    %c0_i32 = arith.constant 0 : i32
    %c0_i32_0 = arith.constant 0 : i32
    %c0_i32_1 = arith.constant 0 : i32
    return %c0_i32, %c0_i32_0 : i32, i32
  }
  func.func @transform_6(%arg0: i32) -> i32 {
    %c0_i32 = arith.constant 0 : i32
    %c0_i32_0 = arith.constant 0 : i32
    return %c0_i32 : i32
  }
  func.func @transform_7(%arg0: i32) -> (i32, i32) {
    %c0_i32 = arith.constant 0 : i32
    %c0_i32_0 = arith.constant 0 : i32
    return %c0_i32, %arg0 : i32, i32
  }
}

</mosaic_0001>

<bundles_post_ra>
// kernel: tpu_custom_call.1
= control target key start
LH: loop header
LB: loop body
LE: loop exit
PB: predicated region body
PF: predicated region fallthrough
CT: control target
= control target key end

     0   :  { %13 = vsyncpa [#allocation4], 0  ;;  %s717_s0 = inlined_call_operand.hbm [shape: f32[8,32], index: 0, kind: input, shape index: {}]   ;;  %s718_s1 = inlined_call_operand.hbm [shape: bf16[32,256], index: 1, kind: input, shape index: {}]   ;;  %s719_s2 = inlined_call_operand.vmem [shape: f32[1,256], index: 2, kind: input, shape index: {}]   ;;  %s720_s3 = inlined_call_operand.hbm [shape: bf16[256,128], index: 3, kind: input, shape index: {}]   ;;  %s721_s4 = inlined_call_operand.vmem [shape: f32[1,128], index: 4, kind: input, shape index: {}]   ;;  %s722_s5 = inlined_call_operand.vmem [shape: f32[8,128], index: 5, kind: input, shape index: {}]   ;;  %s723_s6 = inlined_call_operand.<no memory space> [shape: f32[1], index: 6, kind: input, shape index: {}]   ;;  %s724_s7 = inlined_call_operand.hbm [shape: f32[1,8], index: 7, kind: output, shape index: {}]  }
   0x1   :  { %14 = vsyncpa [#allocation7], 0 }
   0x2   :  { %15 = vsyncpa [#allocation5], 0  ;;  %s606_s24 = smov [#allocation6]   ;;  %s512_s28 = scalar_lea.hbm %s718_s1, 512 }
   0x3   :  { %s31_s25 = sshll.u32 %s606_s24, 4  ;;  %p513_p0 = scmp.ne.s32.totalorder %s718_s1, %s512_s28  ;;  %s32_s25 = int_to_ptr.vmem [resolvable:$true] %s31_s25 }
   0x4   :  { %p516_p1 = scmp.lt.u32.totalorder %s512_s28, %s718_s1 }
   0x6   :  { %p518_p2 = pnand %p516_p1, %p513_p0 }
   0x8   :  { %521 = shalt.err (!%p518_p2)
}
   0x9   :  { %s522_s10 = scalar_lea.vmem %s32_s25, 512  ;;  %p527_p4 = scmp.lt.s32.totalorder %s32_s25, %s32_s25 }
   0xa   :  { %p523_p3 = scmp.ne.s32.totalorder %s32_s25, %s522_s10  ;;  %p528_p5 = scmp.lt.s32.totalorder %s522_s10, %s522_s10 }
   0xc   :  { %p529_p6 = por %p528_p5, %p527_p4 }
   0xe   :  { %p530_p7 = pnand %p529_p6, %p523_p3 }
  0x10   :  { %533 = shalt.err (!%p530_p7)
}
  0x11   :  { %s607_s11 = smov 128   ;;  %s608_s12 = smov 8  }
  0x12   :  { %37 = dma.hbm_to_vmem [thread:$0]  %s718_s1, 512, %s32_s25, [#allocation7], %s607_s11, %s607_s11, %s608_s12  }
  0x13   :  { %s609_s15 = smov [#allocation3]   ;;  %s610_s17 = smov [#allocation8]  }
  0x14   :  { %s22_s16 = sshll.u32 %s609_s15, 4  ;;  %s45_s18 = sshll.u32 %s610_s17, 4  ;;  %s23_s16 = int_to_ptr.vmem [resolvable:$true] %s22_s16  ;;  %s46_s18 = int_to_ptr.vmem [resolvable:$true] %s45_s18 }
  0x15   :  { %s534_s21 = scalar_lea.hbm %s717_s0, 128 }
  0x16   :  { %p535_p8 = scmp.ne.s32.totalorder %s717_s0, %s534_s21  ;;  %p538_p9 = scmp.lt.u32.totalorder %s534_s21, %s717_s0 }
  0x18   :  { %p540_p10 = pnand %p538_p9, %p535_p8 }
  0x1a   :  { %543 = shalt.err (!%p540_p10)
}
  0x1b   :  { %s544_s1 = scalar_lea.vmem %s23_s16, 128  ;;  %p549_p12 = scmp.lt.s32.totalorder %s23_s16, %s23_s16 }
  0x1c   :  { %p545_p11 = scmp.ne.s32.totalorder %s23_s16, %s544_s1  ;;  %p550_p13 = scmp.lt.s32.totalorder %s544_s1, %s544_s1 }
  0x1e   :  { %p551_p0 = por %p550_p13, %p549_p12 }
  0x20   :  { %p552_p1 = pnand %p551_p0, %p545_p11 }
  0x22   :  { %555 = shalt.err (!%p552_p1)
}
  0x23   :  { %25 = dma.hbm_to_vmem [thread:$0]  %s717_s0, 128, %s23_s16, [#allocation4]  }
  0x24   :  { %s556_s30 = scalar_lea.hbm %s720_s3, 2048 }
  0x25   :  { %p557_p2 = scmp.ne.s32.totalorder %s720_s3, %s556_s30  ;;  %p560_p3 = scmp.lt.u32.totalorder %s556_s30, %s720_s3 }
  0x27   :  { %p562_p4 = pnand %p560_p3, %p557_p2 }
  0x29   :  { %565 = shalt.err (!%p562_p4)
}
  0x2a   :  { %s566_s12 = scalar_lea.vmem %s46_s18, 2048  ;;  %p571_p6 = scmp.lt.s32.totalorder %s46_s18, %s46_s18 }
  0x2b   :  { %p567_p5 = scmp.ne.s32.totalorder %s46_s18, %s566_s12  ;;  %p572_p7 = scmp.lt.s32.totalorder %s566_s12, %s566_s12 }
  0x2d   :  { %p573_p8 = por %p572_p7, %p571_p6 }
  0x2f   :  { %p574_p9 = pnand %p573_p8, %p567_p5 }
  0x31   :  { %577 = shalt.err (!%p574_p9)
}
  0x32   :  { %s611_s0 = smov 64   ;;  %s612_s13 = smov 4  }
  0x33   :  { %51 = dma.hbm_to_vmem [thread:$0]  %s720_s3, 2048, %s46_s18, [#allocation7], %s611_s0, %s611_s0, %s612_s13  }
  0x34   :  { %600 = dma.done.wait [#allocation4], 128  }
  0x35   :  { %601 = vsyncadd [#allocation4], 4294967168 }
  0x36   :  { %602 = dma.done.wait [#allocation7], 2560  }
  0x37   :  { %603 = vsyncadd [#allocation7], 4294964736  ;;  %v613_v0 = vmov 0   ;;  %v488_v1 = vld [vmem:[#allocation6 + $0x4] ss:$8 sps:$4 sm:$0xff]   ;;  %v68_v5 = vld [vmem:[#allocation3] sm:$0xff]  ;;  %v76_v23 = vlaneseq  ;;  %v403_v50 = vstv %s723_s6 }
  0x38   :  { %142 = vmatprep.mubr.bf16.mxu0 %v613_v0  ;;  %v490_v2 = vld [vmem:[#allocation6] ss:$8 sps:$4 sm:$0xff]   ;;  %110 = vmatprep.subr.bf16.mxu0 %v488_v1  ;;  %v491_v3 = vld [vmem:[#allocation6 + $0x14] ss:$8 sps:$4 sm:$0xff]   ;;  %v493_v4 = vld [vmem:[#allocation6 + $0x10] ss:$8 sps:$4 sm:$0xff]   ;;  %v69_v9 = vpack.c.bf16 %v68_v5, %v68_v5 }
  0x39   :  { %111 = vmatpush1.bf16.msra.mxu0 %v490_v2  ;;  %v494_v6 = vld [vmem:[#allocation8 + $0x40] sm:$0xff]   ;;  %v496_v8 = vld [vmem:[#allocation8 + $0x48] sm:$0xff]   ;;  %vm106_vm0 = vcmask 261120   ;;  %v498_v11 = vld [vmem:[#allocation8 + $0x50] sm:$0xff]   ;;  %v77_v24 = vshrl.u32 %v76_v23, 7  ;;  %v614_v40 = vmov 0.0  }
  0x3a   :  { %112 = vmatprep.subr.bf16.mxu0 %v491_v3  ;;  %v495_v7 = vld [vmem:[#allocation8] sm:$0xff]   ;;  %448 = vmatprep.subr.bf16.mxu1 %v494_v6  ;;  %v497_v10 = vld [vmem:[#allocation8 + $0x8] sm:$0xff]   ;;  %v499_v12 = vld [vmem:[#allocation8 + $0x10] sm:$0xff]   ;;  %vm615_vm1 = vmmov 0   ;;  %vm408_vm2 = vcmask 57344  }
  0x3b   :  { %449 = vmatpush3.bf16.msra.mxu1 %v495_v7  ;;  %v500_v13 = vld [vmem:[#allocation8 + $0x58] sm:$0xff]   ;;  %v502_v15 = vld [vmem:[#allocation8 + $0x60] sm:$0xff]   ;;  %v504_v17 = vld [vmem:[#allocation8 + $0x68] sm:$0xff]   ;;  %v78_v25 = vsub.s32 0, %v77_v24  ;;  %v82_v27 = vsub.s32 1, %v77_v24 }
  0x3c   :  { %450 = vmatprep.subr.bf16.mxu1 %v496_v8  ;;  %v501_v14 = vld [vmem:[#allocation8 + $0x18] sm:$0xff]   ;;  %v503_v16 = vld [vmem:[#allocation8 + $0x20] sm:$0xff]   ;;  %v505_v18 = vld [vmem:[#allocation8 + $0x28] sm:$0xff]  }
  0x3d   :  { %113 = vmatpush1.bf16.msra.mxu0 %v493_v4  ;;  %v506_v19 = vld [vmem:[#allocation8 + $0x70] sm:$0xff]   ;;  %v508_v21 = vld [vmem:[#allocation8 + $0x78] sm:$0xff]  }
  0x3e   :  { %v507_v20 = vld [vmem:[#allocation8 + $0x30] sm:$0xff]   ;;  %v509_v22 = vld [vmem:[#allocation8 + $0x38] sm:$0xff]   ;;  %472 = vmatprep.subr.mxu0 %v614_v40 }
  0x3f   :  { %451 = vmatpush3.bf16.msra.mxu1 %v497_v10  ;;  %v74_v26 = vld [vmem:[%s719_s2] sm:$0x3] }
  0x40   :  { %430 = vmatmul.mubr.msk.bf16.vlgmr.msra.gmra.mrb[0].mxu0 %vm106_vm0, %v69_v9  ;;  %452 = vmatprep.subr.bf16.mxu1 %v498_v11  ;;  %v79_v28 = vrot.slane %v74_v26, %v78_v25  ;;  %v83_v29 = vrot.slane %v74_v26, %v82_v27  ;;  %v431_v42 = vld [vmem:[%s721_s4] ss:$0 sm:$0xff]  ;;  %s616_s4 = smov [#allocation9]  }
  0x41   :  { %474 = vmatprep.mubr.msk.f32.mxu0 %vm615_vm1, %v614_v40  ;;  %v331_v49 = vld [vmem:[%s722_s5] sm:$0xff]  ;;  %s416_s22 = sshll.u32 %s616_s4, 4  ;;  %s417_s22 = int_to_ptr.vmem [resolvable:$true] %s416_s22 }
  0x42   :  { %s578_s23 = scalar_lea.vmem %s417_s22, 16  ;;  %s582_s5 = scalar_lea.vmem %s417_s22, 32 }
  0x43   :  { %453 = vmatpush3.bf16.msra.mxu1 %v499_v12  ;;  %p579_p10 = scmp.ne.s32.totalorder %s417_s22, %s578_s23  ;;  %p583_p11 = scmp.lt.s32.totalorder %s417_s22, %s417_s22 }
  0x44   :  { %454 = vmatprep.subr.bf16.mxu1 %v500_v13  ;;  %p584_p12 = scmp.lt.s32.totalorder %s582_s5, %s578_s23 }
  0x46   :  { %p585_p13 = por %p584_p12, %p583_p11 }
  0x47   :  { %455 = vmatpush3.bf16.msra.mxu1 %v501_v14 }
  0x48   :  { %456 = vmatprep.subr.bf16.mxu1 %v502_v15  ;;  %p586_p0 = pnand %p585_p13, %p579_p10 }
  0x4b   :  { %457 = vmatpush3.bf16.msra.mxu1 %v503_v16 }
  0x4c   :  { %458 = vmatprep.subr.bf16.mxu1 %v504_v17 }
  0x4f   :  { %459 = vmatpush3.bf16.msra.mxu1 %v505_v18 }
  0x50   :  { %460 = vmatprep.subr.bf16.mxu1 %v506_v19 }
  0x53   :  { %461 = vmatpush3.bf16.msra.mxu1 %v507_v20 }
  0x54   :  { %462 = vmatprep.subr.bf16.mxu1 %v508_v21 }
  0x57   :  { %463 = vmatpush3.bf16.msra.mxu1 %v509_v22 }
 0x113   :  { %v144_v30 = vpop.f32.mrb[0].mxu0 }
 0x114   :  { %v145_v31 = vadd.f32 %v144_v30, %v79_v28  ;;  %v146_v32 = vpop.f32.mrb[1].mxu0 }
 0x115   :  { %v147_v33 = vadd.f32 %v146_v32, %v83_v29  ;;  %v148_v34 = vpop.f32.mrb[2].mxu0 }
 0x116   :  { %v151_v35 = vmax.f32 %v145_v31, 0.0  ;;  %v149_v36 = vpop.f32.mrb[3].mxu0 }
 0x117   :  { %v152_v37 = vmax.f32 %v147_v33, 0.0 }
 0x118   :  { %v153_v39 = vpack.c.bf16 %v151_v35, %v151_v35 }
 0x119   :  { %v154_v38 = vpack.c.bf16 %v152_v37, %v152_v37 }
 0x11b   :  { %322 = vmatprep.mubr.bf16.mxu1 %v154_v38 }
 0x11c   :  { %323 = vmatmul.mubr.bf16.vlgmr.msra.gmra.mrb[0].mxu1 %v153_v39 }
 0x1ef   :  { %v464_v41 = vpop.f32.mrb[0].mxu1 }
 0x1f0   :  { %v465_v43 = vpop.f32.mrb[1].mxu1 }
 0x1f1   :  { %v466_v44 = vadd.f32 %v465_v43, %v464_v41  ;;  %v467_v45 = vpop.f32.mrb[2].mxu1 }
 0x1f2   :  { %v468_v46 = vpop.f32.mrb[3].mxu1 }
 0x1f3   :  { %v325_v47 = vadd.f32 %v466_v44, %v431_v42 }
 0x1f5   :  { %v330_v48 = vmax.f32 %v325_v47, 0.0 }
 0x1f7   :  { %473 = vmatpush3.xpose.msra.mxu0 %v330_v48 }
 0x1fa   :  { %475 = vmatmul.mubr.f32.vlgmr.msra.gmra.mrb[4].mxu0 %v331_v49 }
 0x2cd   :  { %v398_v51 = vpop.f32.mrb[4].mxu0 }
 0x2ce   :  { %v404_v52 = vadd.f32 %v403_v50, %v398_v51  ;;  %v476_v53 = vpop.f32.mrb[5].mxu0 }
 0x2d0   :  { %v405_v54 = vsub.f32 %v404_v52, %v404_v52 }
 0x2d2   :  { %v406_v55 = vmul.f32 1.442695, %v405_v54 }
 0x2d4   :  { %510 = vpow2.f32 %v406_v55 }
 0x2de   :  { %v511_v56 = vpop.eup %510 }
 0x2df   :  { %409 = vst.msk [vmem:[#allocation9] sm:$0x1] %vm408_vm2, %v511_v56 }
 0x2e0   :  { %589 = shalt.err (!%p586_p0)
}
 0x2e1   :  { %s590_s26 = scalar_lea.hbm %s724_s7, 16 }
 0x2e2   :  { %p591_p1 = scmp.ne.s32.totalorder %s724_s7, %s590_s26  ;;  %p594_p2 = scmp.lt.u32.totalorder %s590_s26, %s724_s7 }
 0x2e4   :  { %p596_p3 = pnand %p594_p2, %p591_p1 }
 0x2e6   :  { %599 = shalt.err (!%p596_p3)
}
 0x2e7   :  { %419 = dma.vmem_to_hbm [thread:$0]  %s417_s22, 16, %s724_s7, [#allocation5]  }
 0x2e8   :  { %604 = dma.done.wait [#allocation5], 16  }
 0x2e9   :  { %605 = vsyncadd [#allocation5], 4294967280 }
 0x2ea   :  { %423 = vsyncpa [#allocation4], 1 }
 0x2eb   :  { %424 = vsyncpa [#allocation7], 1 }
 0x2ec   :  { %425 = vsyncpa [#allocation5], 1 }

</bundles_post_ra>
